<compile_context>
chip_gen: v5e
topology: v5e:2x2
jax: 0.10.0
libtpu: 0.0.40
codegen_flags: <defaults>
</compile_context>

<pallas_src>
import math

import jax
import jax.numpy as jnp
from jax.experimental import pallas as pl
from jax.experimental.pallas import tpu as pltpu


def nonorm_kernel(x_ref, p_ref, o_ref):
    # x_ref: (tile_rows, lane); p_ref: (2, lane) f32 (row 0 = weight, row 1 = bias).
    x = x_ref[...].astype(jnp.float32)
    w = p_ref[0:1, :]
    b = p_ref[1:2, :]
    o_ref[...] = (x * w + b).astype(o_ref.dtype)


def _vmem_capacity_bytes():
    try:
        return int(pltpu.get_tpu_info().vmem_capacity_bytes)
    except Exception:
        return 64 * 1024 * 1024  # conservative fallback (v7x per-TC VMEM)


def _num_tensorcores(vmem_bytes):
    """TensorCores per chip. Query the runtime; fall back to a VMEM heuristic."""
    try:
        info = pltpu.get_tpu_info()
        for attr in ("num_tensorcores", "tensorcores_per_chip", "num_cores",
                     "core_count"):
            n = getattr(info, attr, None)
            if n:
                return int(n)
    except Exception:
        pass
    # v7x: 64 MiB VMEM per TC, 2 TCs/chip; v5e/v6e: 128 MiB, 1 TC/chip.
    return 2 if vmem_bytes <= (64 << 20) else 1


def _sublane_multiple(itemsize):
    # f32 -> 8, bf16 -> 16, int8/fp8 -> 32 (packed sublanes).
    return max(8, 32 // max(1, itemsize))


def _pick_tile_rows(rows, lane, itemsize):
    """Row tile sized from a per-block byte target (VMEM-generation aware)."""
    vmem = _vmem_capacity_bytes()
    num_tc = _num_tensorcores(vmem)
    sub = _sublane_multiple(itemsize)

    # ~8 MiB blocks when VMEM/TC is 64 MiB (v7x), ~16 MiB otherwise (v5e/v6e).
    # Double-buffered in+out = 4x block, leaving ample headroom in both cases.
    block_target = (8 << 20) if vmem <= (64 << 20) else (16 << 20)

    tile = block_target // (lane * itemsize)
    tile = max(sub, (tile // sub) * sub)

    # Only split the row axis when there is more than one TensorCore, and then
    # aim for >=2 blocks per core so each core still gets a software pipeline.
    if num_tc > 1 and rows >= 2 * num_tc * sub:
        per_core_tile = pl.cdiv(rows, 2 * num_tc)
        per_core_tile = max(sub, (per_core_tile // sub) * sub)
        tile = min(tile, per_core_tile)

    if tile >= rows:
        return rows  # single full block (block dim == array dim is always legal)
    return tile


def _vmem_limit_bytes(tile_rows, lane, itemsize):
    # 2x double-buffered input + 2x double-buffered output + resident params
    # (padded to 8 sublanes of f32) + headroom for compiler scratch.
    needed = 4 * tile_rows * lane * itemsize + 8 * lane * 4 + (4 << 20)
    limit = max(needed, 16 << 20)
    return int(min(limit, _vmem_capacity_bytes() * 3 // 4))


def nonorm(x, weight, bias, *, tile_rows=None):
    """x: (..., feat); weight, bias: (feat,).  Returns x * weight + bias."""
    orig_shape = x.shape
    feat = orig_shape[-1]

    # Keep params in f32 and compute in f32 inside the kernel (param HBM
    # traffic is negligible; this preserves PyTorch-style numerics for bf16 x).
    w_f32 = weight.astype(jnp.float32)
    b_f32 = bias.astype(jnp.float32)

    x2d = x.reshape(-1, feat)
    orig_rows = x2d.shape[0]
    rows = orig_rows

    # Lane-dense layout: fold rows into the feature axis until the last dim is
    # a multiple of 128 (vreg lane width). If rows don't divide evenly, pad
    # with zero rows so the whole array still gets unmasked full-lane stores.
    fold = 1
    if feat % 128 != 0:
        fold = math.lcm(feat, 128) // feat
        if rows % fold != 0:
            pad = fold - rows % fold
            x2d = jnp.concatenate(
                [x2d, jnp.zeros((pad, feat), dtype=x2d.dtype)], axis=0)
            rows += pad
    lane = feat * fold
    if fold > 1:
        x2d = x2d.reshape(rows // fold, lane)
        w_lane = jnp.tile(w_f32, fold)
        b_lane = jnp.tile(b_f32, fold)
        rows = rows // fold
    else:
        w_lane = w_f32
        b_lane = b_f32

    # Single resident (2, lane) f32 param buffer: row 0 = weight, row 1 = bias.
    params = jnp.stack([w_lane, b_lane], axis=0)

    itemsize = jnp.dtype(x.dtype).itemsize
    if tile_rows is None:
        tile_rows = _pick_tile_rows(rows, lane, itemsize)
    tile_rows = min(tile_rows, rows)

    grid = (pl.cdiv(rows, tile_rows),)  # ragged last block is masked by Pallas

    out = pl.pallas_call(
        nonorm_kernel,
        out_shape=jax.ShapeDtypeStruct((rows, lane), x.dtype),
        grid_spec=pltpu.PrefetchScalarGridSpec(
            num_scalar_prefetch=0,
            grid=grid,
            in_specs=[
                pl.BlockSpec((tile_rows, lane), lambda i: (i, 0)),
                pl.BlockSpec((2, lane), lambda i: (0, 0)),  # params resident in VMEM
            ],
            out_specs=pl.BlockSpec((tile_rows, lane), lambda i: (i, 0)),
        ),
        compiler_params=pltpu.CompilerParams(
            dimension_semantics=("parallel",),
            vmem_limit_bytes=_vmem_limit_bytes(tile_rows, lane, itemsize),
        ),
    )(x2d, params)

    # Undo folding / padding and restore the original shape.
    out2d = out.reshape(-1, feat)[:orig_rows]
    return out2d.reshape(orig_shape)


if __name__ == "__main__":
    key = jax.random.PRNGKey(0)
    kx, kw, kb = jax.random.split(key, 3)

    batch, seq, hidden = 2, 8, 32  # feat_size = hidden = 32

    x = jax.random.normal(kx, (batch, seq, hidden), dtype=jnp.float32)
    # Module init is ones/zeros; use seeded random values so the test is
    # non-trivial but deterministic.
    weight = jax.random.normal(kw, (hidden,), dtype=jnp.float32)
    bias = jax.random.normal(kb, (hidden,), dtype=jnp.float32)

    out = nonorm(x, weight, bias)
    out = jax.block_until_ready(out)

    ref = x * weight + bias
    assert out.shape == x.shape
    assert jnp.allclose(out, ref, atol=1e-6, rtol=1e-6)

    print("KERNEL_OK")
</pallas_src>

<mosaic_0001>
module attributes {stable_mosaic.version = 11 : i64} {
  func.func @nonorm_kernel(%arg0: i32, %arg1: memref<4x128xf32, #tpu.memory_space<vmem>>, %arg2: memref<2x128xf32, #tpu.memory_space<vmem>>, %arg3: memref<4x128xf32, #tpu.memory_space<vmem>>) attributes {dimension_semantics = [#tpu.dimension_semantics<parallel>], iteration_bounds = array<i64: 1>, scalar_prefetch = 0 : i64, scratch_operands = 0 : i64, tpu.core_type = #tpu.core_type<tc>, window_params = [{transform_indices = @transform_0, window_bounds = array<i64: 4, 128>}, {pipeline_mode = #tpu.pipeline_mode<synchronous>, transform_indices = @transform_1, window_bounds = array<i64: 2, 128>}, {transform_indices = @transform_2, window_bounds = array<i64: 4, 128>}]} {
    %c0 = arith.constant 0 : index
    %c0_0 = arith.constant 0 : index
    %0 = vector.load %arg1[%c0, %c0_0] : memref<4x128xf32, #tpu.memory_space<vmem>>, vector<4x128xf32>
    %c0_1 = arith.constant 0 : index
    %c0_2 = arith.constant 0 : index
    %1 = vector.load %arg2[%c0_1, %c0_2] : memref<2x128xf32, #tpu.memory_space<vmem>>, vector<1x128xf32>
    %c1 = arith.constant 1 : index
    %c0_3 = arith.constant 0 : index
    %2 = vector.load %arg2[%c1, %c0_3] : memref<2x128xf32, #tpu.memory_space<vmem>>, vector<1x128xf32>
    %3 = vector.broadcast %1 : vector<1x128xf32> to vector<4x128xf32>
    %4 = arith.mulf %0, %3 : vector<4x128xf32>
    %5 = vector.broadcast %2 : vector<1x128xf32> to vector<4x128xf32>
    %6 = arith.addf %4, %5 : vector<4x128xf32>
    %c0_4 = arith.constant 0 : index
    %c0_5 = arith.constant 0 : index
    %7 = vector.load %arg3[%c0_4, %c0_5] : memref<4x128xf32, #tpu.memory_space<vmem>>, vector<4x128xf32>
    tpu.vector_store %arg3[%c0_4, %c0_5], %6 {strides = array<i32>} : memref<4x128xf32, #tpu.memory_space<vmem>>, vector<4x128xf32>,
    return
  }
  func.func @transform_0(%arg0: i32) -> (i32, i32) {
    %c0_i32 = arith.constant 0 : i32
    %c0_i32_0 = arith.constant 0 : i32
    return %arg0, %c0_i32 : i32, i32
  }
  func.func @transform_1(%arg0: i32) -> (i32, i32) {
    %c0_i32 = arith.constant 0 : i32
    %c0_i32_0 = arith.constant 0 : i32
    %c0_i32_1 = arith.constant 0 : i32
    return %c0_i32, %c0_i32_0 : i32, i32
  }
  func.func @transform_2(%arg0: i32) -> (i32, i32) {
    %c0_i32 = arith.constant 0 : i32
    %c0_i32_0 = arith.constant 0 : i32
    return %arg0, %c0_i32 : i32, i32
  }
}

</mosaic_0001>

<bundles_post_ra>
// kernel: tpu_custom_call.1
= control target key start
LH: loop header
LB: loop body
LE: loop exit
PB: predicated region body
PF: predicated region fallthrough
CT: control target
= control target key end

     0   :  { %7 = vsyncpa [#allocation3], 0  ;;  %s176_s0 = inlined_call_operand.hbm [shape: f32[4,128], index: 0, kind: input, shape index: {}]   ;;  %s177_s1 = inlined_call_operand.hbm [shape: f32[2,128], index: 1, kind: input, shape index: {}]   ;;  %s178_s2 = inlined_call_operand.hbm [shape: f32[4,128], index: 2, kind: output, shape index: {}]  }
   0x1   :  { %8 = vsyncpa [#allocation6], 0 }
   0x2   :  { %9 = vsyncpa [#allocation4], 0  ;;  %s15_s11 = sshll.u32 %s176_s0, 4  ;;  %s149_s12 = smov [#allocation2]   ;;  %s16_s11 = int_to_ptr.hbm [resolvable:$true] %s15_s11 }
   0x3   :  { %s17_s13 = sshll.u32 %s149_s12, 4  ;;  %s26_s16 = sshll.u32 %s177_s1, 4  ;;  %s18_s13 = int_to_ptr.vmem [resolvable:$true] %s17_s13  ;;  %s27_s16 = int_to_ptr.hbm [resolvable:$true] %s26_s16 }
   0x4   :  { %20 = dma.hbm_to_vmem [thread:$0]  %s16_s11, 64, %s18_s13, [#allocation3]  }
   0x5   :  { %s150_s17 = smov [#allocation5]  }
   0x6   :  { %s28_s18 = sshll.u32 %s150_s17, 4  ;;  %s29_s18 = int_to_ptr.vmem [resolvable:$true] %s28_s18 }
   0x7   :  { %31 = dma.hbm_to_vmem [thread:$0]  %s27_s16, 32, %s29_s18, [#allocation6]  }
   0x8   :  { %143 = dma.done.wait [#allocation3], 64  }
   0x9   :  { %144 = vsyncadd [#allocation3], 4294967232 }
   0xa   :  { %145 = dma.done.wait [#allocation6], 32  }
   0xb   :  { %146 = vsyncadd [#allocation6], 4294967264  ;;  %v40_v0 = vld [vmem:[#allocation2] sm:$0xf]  ;;  %v69_v1 = vld [vmem:[#allocation5] ss:$0 sm:$0xff] }
   0xc   :  { %v70_v2 = vld [vmem:[#allocation5 + $0x1] ss:$0 sm:$0xff]  ;;  %s151_s0 = smov [#allocation7]   ;;  %s55_s22 = sshll.u32 %s178_s2, 4  ;;  %v44_v3 = vmul.f32 %v69_v1, %v40_v0  ;;  %s56_s22 = int_to_ptr.hbm [resolvable:$true] %s55_s22 }
   0xd   :  { %s53_s19 = sshll.u32 %s151_s0, 4  ;;  %s54_s19 = int_to_ptr.vmem [resolvable:$true] %s53_s19 }
   0xe   :  { %v46_v4 = vadd.f32 %v70_v2, %v44_v3 }
  0x10   :  { %47 = vst [vmem:[#allocation7] sm:$0xf] %v46_v4 }
  0x11   :  { %58 = dma.vmem_to_hbm [thread:$0]  %s54_s19, 64, %s56_s22, [#allocation4]  }
  0x12   :  { %147 = dma.done.wait [#allocation4], 64  }
  0x13   :  { %148 = vsyncadd [#allocation4], 4294967232 }
  0x14   :  { %63 = vsyncpa [#allocation3], 1 }
  0x15   :  { %64 = vsyncpa [#allocation6], 1 }
  0x16   :  { %65 = vsyncpa [#allocation4], 1 }

</bundles_post_ra>
